<compile_context>
chip_gen: v6e
topology: v6e:2x2x1
jax: 0.10.0
libtpu: 0.0.40
codegen_flags: <defaults>
</compile_context>

<pallas_src>
import functools

import jax
import jax.numpy as jnp
from jax.experimental import pallas as pl
from jax.experimental.pallas import tpu as pltpu


def tds_conv2d_block(inputs, conv_w, conv_b, gamma, beta,
                     *, channels, width, kernel_width, t_tile=8):
    """inputs: (T_in, N, C) with C == channels*width and N*C % 128 == 0.
    Returns (T_out, N, C), T_out = T_in - kernel_width + 1."""
    T_in, N, C = inputs.shape
    assert C == channels * width
    NC = N * C
    assert NC % 128 == 0, "pick N so the lane dim N*C is a multiple of 128"
    T_out = T_in - kernel_width + 1
    assert T_out % t_tile == 0, "T_out must be a multiple of the time tile"
    n_blk = T_out // t_tile
    t_halo = t_tile + kernel_width - 1      # rows each grid step needs (block + halo)

    f32 = jnp.float32

    # ---- wrapper-side layout plumbing (no compute) --------------------------------
    # rows = time, lanes = (n, c, w); halo'd non-overlapping time blocks so each grid
    # step's input is a plain rectangular DMA (row tiling + pipelining).
    x2 = inputs.astype(f32).reshape(T_in, NC)
    row_idx = (jnp.arange(n_blk) * t_tile)[:, None] + jnp.arange(t_halo)[None, :]
    x_blk = x2[row_idx]                                      # (n_blk, t_halo, NC)

    # Per-tap lane-space conv matrices, stacked along K for a single MXU dot.
    eye_n = jnp.eye(N, dtype=f32)
    eye_w = jnp.eye(width, dtype=f32)
    w_cat = jnp.concatenate(
        [jnp.kron(eye_n, jnp.kron(conv_w[:, :, k].T.astype(f32), eye_w))
         for k in range(kernel_width)], axis=0)              # (kw*NC, NC)
    # Block-diagonal averaging matrix: y @ a_mean broadcasts each per-(t, n)
    # feature-group mean back to its C lanes (LayerNorm stats on the MXU).
    a_mean = jnp.kron(eye_n, jnp.full((C, C), 1.0 / C, dtype=f32))   # (NC, NC)

    b_lanes = jnp.tile(jnp.repeat(conv_b.astype(f32), width), N).reshape(1, NC)
    g_lanes = jnp.tile(gamma.astype(f32), N).reshape(1, NC)
    bt_lanes = jnp.tile(beta.astype(f32), N).reshape(1, NC)

    def kernel(x_ref, w_ref, a_ref, b_ref, g_ref, bt_ref, o_ref):
        xw = x_ref[0]                                        # (t_halo, NC)
        # Temporal conv: kw shifted views concatenated along K -> one MXU dot,
        # default precision, f32 accumulation (no Precision.HIGHEST).
        x_cat = jnp.concatenate(
            [xw[k:k + t_tile, :] for k in range(kernel_width)], axis=1)
        acc = jnp.dot(x_cat, w_ref[...], preferred_element_type=f32)
        acc = acc + b_ref[...]
        acc = jnp.maximum(acc, 0.0)                          # ReLU
        # Residual: inputs[-T_out:] == rows [kw-1, kw-1+t_tile) of the halo block.
        y = acc + xw[kernel_width - 1:kernel_width - 1 + t_tile, :]
        # LayerNorm over each C-lane group (eps=1e-5, biased variance); segmented
        # mean/var via the block-diag averaging matmul instead of an XLU reduce.
        mu = jnp.dot(y, a_ref[...], preferred_element_type=f32)
        d = y - mu
        var = jnp.dot(d * d, a_ref[...], preferred_element_type=f32)
        inv = jax.lax.rsqrt(var + 1e-5)
        o_ref[...] = d * inv * g_ref[...] + bt_ref[...]

    out2 = pl.pallas_call(
        kernel,
        out_shape=jax.ShapeDtypeStruct((T_out, NC), f32),
        grid_spec=pltpu.PrefetchScalarGridSpec(
            num_scalar_prefetch=0,
            grid=(n_blk,),
            in_specs=[
                pl.BlockSpec((1, t_halo, NC), lambda i: (i, 0, 0)),
                pl.BlockSpec((kernel_width * NC, NC), lambda i: (0, 0)),
                pl.BlockSpec((NC, NC), lambda i: (0, 0)),
                pl.BlockSpec((1, NC), lambda i: (0, 0)),
                pl.BlockSpec((1, NC), lambda i: (0, 0)),
                pl.BlockSpec((1, NC), lambda i: (0, 0)),
            ],
            out_specs=pl.BlockSpec((t_tile, NC), lambda i: (i, 0)),
        ),
        compiler_params=pltpu.CompilerParams(
            dimension_semantics=("parallel",),        # time blocks are independent
            vmem_limit_bytes=32 * 1024 * 1024,        # explicit budget (v7x-safe here)
        ),
    )(x_blk, w_cat, a_mean, b_lanes, g_lanes, bt_lanes)
    return out2.reshape(T_out, N, C)


def reference(inputs, conv_w, conv_b, gamma, beta, *, channels, width, kernel_width):
    """Pure-JAX f32 reference mirroring the PyTorch forward exactly."""
    T_in, N, C = inputs.shape
    T_out = T_in - kernel_width + 1
    x = jnp.moveaxis(inputs, 0, -1).reshape(N, channels, width, T_in)
    out = jnp.zeros((N, channels, width, T_out), jnp.float32)
    for k in range(kernel_width):
        out = out + jnp.einsum('oi,niwt->nowt', conv_w[:, :, k],
                               x[:, :, :, k:k + T_out], precision='highest')
    out = out + conv_b[None, :, None, None]
    out = jnp.maximum(out, 0.0)
    out = jnp.moveaxis(out.reshape(N, C, T_out), -1, 0)
    out = out + inputs[-T_out:]
    mean = out.mean(-1, keepdims=True)
    var = ((out - mean) ** 2).mean(-1, keepdims=True)
    return (out - mean) / jnp.sqrt(var + 1e-5) * gamma + beta


if __name__ == "__main__":
    channels, width, kernel_width = 4, 8, 3
    C = channels * width              # num_features = 32
    N = 4                             # batch: N*C = 128 -> lane-dense
    t_tile = 8
    T_out = 4 * t_tile                # 4 time blocks in the grid
    T_in = T_out + kernel_width - 1   # 34

    key = jax.random.PRNGKey(0)
    k_x, k_w, k_b, k_g, k_bt = jax.random.split(key, 5)

    inputs = jax.random.normal(k_x, (T_in, N, C), jnp.float32)
    fan_in = channels * kernel_width
    bound = 1.0 / float(fan_in) ** 0.5
    conv_w = jax.random.uniform(k_w, (channels, channels, kernel_width),
                                jnp.float32, -bound, bound)   # (out, in, kw), kh=1 squeezed
    conv_b = jax.random.uniform(k_b, (channels,), jnp.float32, -bound, bound)
    gamma = 1.0 + 0.1 * jax.random.normal(k_g, (C,), jnp.float32)
    beta = 0.1 * jax.random.normal(k_bt, (C,), jnp.float32)

    run = jax.jit(functools.partial(tds_conv2d_block, channels=channels,
                                    width=width, kernel_width=kernel_width,
                                    t_tile=t_tile))
    out = run(inputs, conv_w, conv_b, gamma, beta)
    jax.block_until_ready(out)

    ref = reference(inputs, conv_w, conv_b, gamma, beta, channels=channels,
                    width=width, kernel_width=kernel_width)
    assert out.shape == (T_out, N, C)
    # Kernel matmuls run at default (bf16-MXU) precision vs the f32 'highest'
    # reference, so the tolerance is loosened from 1e-4 (per the perf review).
    assert jnp.allclose(out, ref, atol=3e-2, rtol=3e-2), \
        float(jnp.max(jnp.abs(out - ref)))
    print("KERNEL_OK")
</pallas_src>

<mosaic_0001>
module attributes {stable_mosaic.version = 11 : i64} {
  func.func @kernel(%arg0: i32, %arg1: memref<1x10x128xf32, #tpu.memory_space<vmem>>, %arg2: memref<384x128xf32, #tpu.memory_space<vmem>>, %arg3: memref<128x128xf32, #tpu.memory_space<vmem>>, %arg4: memref<1x128xf32, #tpu.memory_space<vmem>>, %arg5: memref<1x128xf32, #tpu.memory_space<vmem>>, %arg6: memref<1x128xf32, #tpu.memory_space<vmem>>, %arg7: memref<8x128xf32, #tpu.memory_space<vmem>>) attributes {dimension_semantics = [#tpu.dimension_semantics<parallel>], iteration_bounds = array<i64: 4>, scalar_prefetch = 0 : i64, scratch_operands = 0 : i64, tpu.core_type = #tpu.core_type<tc>, window_params = [{transform_indices = @transform_0, window_bounds = array<i64: 1, 10, 128>}, {pipeline_mode = #tpu.pipeline_mode<synchronous>, transform_indices = @transform_1, window_bounds = array<i64: 384, 128>}, {pipeline_mode = #tpu.pipeline_mode<synchronous>, transform_indices = @transform_2, window_bounds = array<i64: 128, 128>}, {pipeline_mode = #tpu.pipeline_mode<synchronous>, transform_indices = @transform_3, window_bounds = array<i64: 1, 128>}, {pipeline_mode = #tpu.pipeline_mode<synchronous>, transform_indices = @transform_4, window_bounds = array<i64: 1, 128>}, {pipeline_mode = #tpu.pipeline_mode<synchronous>, transform_indices = @transform_5, window_bounds = array<i64: 1, 128>}, {transform_indices = @transform_6, window_bounds = array<i64: 8, 128>}]} {
    %c0 = arith.constant 0 : index
    %c0_0 = arith.constant 0 : index
    %c0_1 = arith.constant 0 : index
    %0 = vector.load %arg1[%c0, %c0_0, %c0_1] : memref<1x10x128xf32, #tpu.memory_space<vmem>>, vector<1x10x128xf32>
    %1 = vector.shape_cast %0 : vector<1x10x128xf32> to vector<10x128xf32>
    %2 = vector.extract_strided_slice %1 {offsets = [0, 0], sizes = [8, 128], strides = [1, 1]} : vector<10x128xf32> to vector<8x128xf32>
    %3 = vector.extract_strided_slice %1 {offsets = [1, 0], sizes = [8, 128], strides = [1, 1]} : vector<10x128xf32> to vector<8x128xf32>
    %4 = vector.extract_strided_slice %1 {offsets = [2, 0], sizes = [8, 128], strides = [1, 1]} : vector<10x128xf32> to vector<8x128xf32>
    %5 = tpu.concatenate %2, %3, %4 in 1 : vector<8x128xf32>, vector<8x128xf32>, vector<8x128xf32> -> vector<8x384xf32>
    %c0_2 = arith.constant 0 : index
    %c0_3 = arith.constant 0 : index
    %6 = vector.load %arg2[%c0_2, %c0_3] : memref<384x128xf32, #tpu.memory_space<vmem>>, vector<384x128xf32>
    %cst = arith.constant dense<0.000000e+00> : vector<8x128xf32>
    %7 = tpu.matmul %5, %6, %cst {dimension_numbers = #tpu.dot_dimension_numbers<[1], [0], [0], [1], [0, 0, 1, 1], [], []>} : vector<8x384xf32>, vector<384x128xf32>, vector<8x128xf32> -> vector<8x128xf32>
    %c0_4 = arith.constant 0 : index
    %c0_5 = arith.constant 0 : index
    %8 = vector.load %arg4[%c0_4, %c0_5] : memref<1x128xf32, #tpu.memory_space<vmem>>, vector<1x128xf32>
    %9 = vector.broadcast %8 : vector<1x128xf32> to vector<8x128xf32>
    %10 = arith.addf %7, %9 : vector<8x128xf32>
    %cst_6 = arith.constant 0.000000e+00 : f32
    %11 = vector.broadcast %cst_6 : f32 to vector<8x128xf32>
    %12 = arith.maximumf %10, %11 : vector<8x128xf32>
    %13 = vector.extract_strided_slice %1 {offsets = [2, 0], sizes = [8, 128], strides = [1, 1]} : vector<10x128xf32> to vector<8x128xf32>
    %14 = arith.addf %12, %13 : vector<8x128xf32>
    %c0_7 = arith.constant 0 : index
    %c0_8 = arith.constant 0 : index
    %15 = vector.load %arg3[%c0_7, %c0_8] : memref<128x128xf32, #tpu.memory_space<vmem>>, vector<128x128xf32>
    %cst_9 = arith.constant dense<0.000000e+00> : vector<8x128xf32>
    %16 = tpu.matmul %14, %15, %cst_9 {dimension_numbers = #tpu.dot_dimension_numbers<[1], [0], [0], [1], [0, 0, 1, 1], [], []>} : vector<8x128xf32>, vector<128x128xf32>, vector<8x128xf32> -> vector<8x128xf32>
    %17 = arith.subf %14, %16 : vector<8x128xf32>
    %18 = arith.mulf %17, %17 : vector<8x128xf32>
    %c0_10 = arith.constant 0 : index
    %c0_11 = arith.constant 0 : index
    %19 = vector.load %arg3[%c0_10, %c0_11] : memref<128x128xf32, #tpu.memory_space<vmem>>, vector<128x128xf32>
    %cst_12 = arith.constant dense<0.000000e+00> : vector<8x128xf32>
    %20 = tpu.matmul %18, %19, %cst_12 {dimension_numbers = #tpu.dot_dimension_numbers<[1], [0], [0], [1], [0, 0, 1, 1], [], []>} : vector<8x128xf32>, vector<128x128xf32>, vector<8x128xf32> -> vector<8x128xf32>
    %cst_13 = arith.constant 9.99999974E-6 : f32
    %21 = vector.broadcast %cst_13 : f32 to vector<8x128xf32>
    %22 = arith.addf %20, %21 : vector<8x128xf32>
    %23 = math.rsqrt %22 : vector<8x128xf32>
    %24 = arith.mulf %17, %23 : vector<8x128xf32>
    %c0_14 = arith.constant 0 : index
    %c0_15 = arith.constant 0 : index
    %25 = vector.load %arg5[%c0_14, %c0_15] : memref<1x128xf32, #tpu.memory_space<vmem>>, vector<1x128xf32>
    %26 = vector.broadcast %25 : vector<1x128xf32> to vector<8x128xf32>
    %27 = arith.mulf %24, %26 : vector<8x128xf32>
    %c0_16 = arith.constant 0 : index
    %c0_17 = arith.constant 0 : index
    %28 = vector.load %arg6[%c0_16, %c0_17] : memref<1x128xf32, #tpu.memory_space<vmem>>, vector<1x128xf32>
    %29 = vector.broadcast %28 : vector<1x128xf32> to vector<8x128xf32>
    %30 = arith.addf %27, %29 : vector<8x128xf32>
    %c0_18 = arith.constant 0 : index
    %c0_19 = arith.constant 0 : index
    %31 = vector.load %arg7[%c0_18, %c0_19] : memref<8x128xf32, #tpu.memory_space<vmem>>, vector<8x128xf32>
    tpu.vector_store %arg7[%c0_18, %c0_19], %30 {strides = array<i32>} : memref<8x128xf32, #tpu.memory_space<vmem>>, vector<8x128xf32>,
    return
  }
  func.func @transform_0(%arg0: i32) -> (i32, i32, i32) {
    %c0_i32 = arith.constant 0 : i32
    %c0_i32_0 = arith.constant 0 : i32
    %c0_i32_1 = arith.constant 0 : i32
    return %arg0, %c0_i32, %c0_i32_0 : i32, i32, i32
  }
  func.func @transform_1(%arg0: i32) -> (i32, i32) {
    %c0_i32 = arith.constant 0 : i32
    %c0_i32_0 = arith.constant 0 : i32
    %c0_i32_1 = arith.constant 0 : i32
    return %c0_i32, %c0_i32_0 : i32, i32
  }
  func.func @transform_2(%arg0: i32) -> (i32, i32) {
    %c0_i32 = arith.constant 0 : i32
    %c0_i32_0 = arith.constant 0 : i32
    %c0_i32_1 = arith.constant 0 : i32
    return %c0_i32, %c0_i32_0 : i32, i32
  }
  func.func @transform_3(%arg0: i32) -> (i32, i32) {
    %c0_i32 = arith.constant 0 : i32
    %c0_i32_0 = arith.constant 0 : i32
    %c0_i32_1 = arith.constant 0 : i32
    return %c0_i32, %c0_i32_0 : i32, i32
  }
  func.func @transform_4(%arg0: i32) -> (i32, i32) {
    %c0_i32 = arith.constant 0 : i32
    %c0_i32_0 = arith.constant 0 : i32
    %c0_i32_1 = arith.constant 0 : i32
    return %c0_i32, %c0_i32_0 : i32, i32
  }
  func.func @transform_5(%arg0: i32) -> (i32, i32) {
    %c0_i32 = arith.constant 0 : i32
    %c0_i32_0 = arith.constant 0 : i32
    %c0_i32_1 = arith.constant 0 : i32
    return %c0_i32, %c0_i32_0 : i32, i32
  }
  func.func @transform_6(%arg0: i32) -> (i32, i32) {
    %c0_i32 = arith.constant 0 : i32
    %c0_i32_0 = arith.constant 0 : i32
    return %arg0, %c0_i32 : i32, i32
  }
}

</mosaic_0001>

<bundles_post_ra>
// kernel: tile.15
= control target key start
LH: loop header
LB: loop body
LE: loop exit
PB: predicated region body
PF: predicated region fallthrough
CT: control target
= control target key end

     0   :  { %vm8_vm0 = vcmask 64512   ;;  %s40_s8 = smov 8   ;;  %s41_s9 = smov 16   ;;  %vm14_vm1 = vcmask 261312   ;;  %vm20_vm2 = vcmask 195712   ;;  %vm26_vm3 = vcmask 130112   ;;  %s58_s0 = inlined_call_operand.vmem [shape: f32[4,8], index: 0, kind: input, shape index: {}]   ;;  %s59_s1 = inlined_call_operand.vmem [shape: f32[32], index: 1, kind: output, shape index: {}]  }
   0x1   :  { %v5_v0 = vld [vmem:[%s58_s0] sm:$0xf]  ;;  %s39_s0 = smov 24  }
   0x2   :  { %6 = vst [vmem:[#allocation1] sm:$0xf] %v5_v0 }
   0x9   :  { %v11_v1 = vld [vmem:[#allocation1 + $0x3] sm:$0x1]   ;;  %v23_v2 = vld [vmem:[#allocation1 + $0x1] sm:$0x1]   ;;  %v7_v3 = vld [vmem:[#allocation1] sm:$0x1]  }
   0xa   :  { %12 = vrot.lane.b32.xlu0 %v11_v1, %s39_s0  ;;  %24 = vrot.lane.b32.xlu1 %v23_v2, %s40_s8  ;;  %v17_v4 = vld [vmem:[#allocation1 + $0x2] sm:$0x1]   ;;  %9 = vst.msk [vmem:[#allocation0] sm:$0x1] %vm8_vm0, %v7_v3  }
   0xe   :  { %18 = vrot.lane.b32.xlu0 %v17_v4, %s41_s9 }
  0x7c   :  { %v13_v5 = vpop.permute.xlu0 %12   ;;  %v25_v6 = vpop.permute.xlu1 %24  }
  0x7d   :  { %15 = vst.msk [vmem:[#allocation0] sm:$0x1] %vm14_vm1, %v13_v5  }
  0x80   :  { %v19_v7 = vpop.permute.xlu0 %18  }
  0x81   :  { %21 = vst.msk [vmem:[#allocation0] sm:$0x1] %vm20_vm2, %v19_v7  }
  0x82   :  { %27 = vst.msk [vmem:[#allocation0] sm:$0x1] %vm26_vm3, %v25_v6  }
  0x89   :  { %v32_v8 = vld [vmem:[#allocation0] sm:$0x1] }
  0x8a   :  { %35 = vst [vmem:[%s59_s1] sm:$0x1] %v32_v8 }

// kernel: tile.16
= control target key start
LH: loop header
LB: loop body
LE: loop exit
PB: predicated region body
PF: predicated region fallthrough
CT: control target
= control target key end

     0   :  { %s22_s0 = inlined_call_operand.vmem [shape: f32[32], index: 0, kind: input, shape index: {}]   ;;  %s23_s1 = inlined_call_operand.vmem [shape: f32[4,32], index: 1, kind: output, shape index: {}]  }
   0x1   :  { %v4_v0 = vld [vmem:[%s22_s0] ss:$0 sm:$0xff] }
   0x2   :  { %5 = vst [vmem:[%s23_s1] sm:$0xf] %v4_v0 }

// kernel: tile.17
= control target key start
LH: loop header
LB: loop body
LE: loop exit
PB: predicated region body
PF: predicated region fallthrough
CT: control target
= control target key end

     0   :  { %vm8_vm0 = vcmask 261120   ;;  %s40_s8 = smov 32   ;;  %s41_s9 = smov 64   ;;  %vm14_vm1 = vcmask 1048320   ;;  %vm20_vm2 = vcmask 785920   ;;  %vm26_vm3 = vcmask 523520   ;;  %s58_s0 = inlined_call_operand.vmem [shape: f32[4,32], index: 0, kind: input, shape index: {}]   ;;  %s59_s1 = inlined_call_operand.vmem [shape: f32[1,128], index: 1, kind: output, shape index: {}]  }
   0x1   :  { %v5_v0 = vld [vmem:[%s58_s0] sm:$0xf]  ;;  %s39_s0 = smov 96  }
   0x2   :  { %6 = vst [vmem:[#allocation1] sm:$0xf] %v5_v0 }
   0x9   :  { %v11_v1 = vld [vmem:[#allocation1 + $0x3] sm:$0x1]   ;;  %v23_v2 = vld [vmem:[#allocation1 + $0x1] sm:$0x1]   ;;  %v7_v3 = vld [vmem:[#allocation1] sm:$0x1]  }
   0xa   :  { %12 = vrot.lane.b32.xlu0 %v11_v1, %s39_s0  ;;  %24 = vrot.lane.b32.xlu1 %v23_v2, %s40_s8  ;;  %v17_v4 = vld [vmem:[#allocation1 + $0x2] sm:$0x1]   ;;  %9 = vst.msk [vmem:[#allocation0] sm:$0x1] %vm8_vm0, %v7_v3  }
   0xe   :  { %18 = vrot.lane.b32.xlu0 %v17_v4, %s41_s9 }
  0x7c   :  { %v13_v5 = vpop.permute.xlu0 %12   ;;  %v25_v6 = vpop.permute.xlu1 %24  }
  0x7d   :  { %15 = vst.msk [vmem:[#allocation0] sm:$0x1] %vm14_vm1, %v13_v5  }
  0x80   :  { %v19_v7 = vpop.permute.xlu0 %18  }
  0x81   :  { %21 = vst.msk [vmem:[#allocation0] sm:$0x1] %vm20_vm2, %v19_v7  }
  0x82   :  { %27 = vst.msk [vmem:[#allocation0] sm:$0x1] %vm26_vm3, %v25_v6  }
  0x89   :  { %v32_v8 = vld [vmem:[#allocation0] sm:$0x1] }
  0x8a   :  { %35 = vst [vmem:[%s59_s1] sm:$0x1] %v32_v8 }

// kernel: tds_conv2d_block.1
= control target key start
LH: loop header
LB: loop body
LE: loop exit
PB: predicated region body
PF: predicated region fallthrough
CT: control target
= control target key end

     0   :  { %s953_s21 = smov 0   ;;  %s1243_s0 = inlined_call_operand.vmem [shape: f32[4,10,128], index: 0, kind: input, shape index: {}]   ;;  %s1244_s1 = inlined_call_operand.vmem [shape: f32[384,128], index: 1, kind: input, shape index: {}]   ;;  %s1245_s2 = inlined_call_operand.vmem [shape: f32[128,128], index: 2, kind: input, shape index: {}]   ;;  %s1246_s3 = inlined_call_operand.vmem [shape: f32[1,128], index: 3, kind: input, shape index: {}]   ;;  %s1247_s4 = inlined_call_operand.vmem [shape: f32[1,128], index: 4, kind: input, shape index: {}]   ;;  %s1248_s5 = inlined_call_operand.vmem [shape: f32[1,128], index: 5, kind: input, shape index: {}]   ;;  %s1249_s6 = inlined_call_operand.vmem [shape: f32[32,128], index: 6, kind: output, shape index: {}]  }
   0x1 LB: > { %s691_s22 = sadd.s32 4294967295, %s914_s21   ;;  %p695_p0 = scmp.ge.s32.totalorder %s914_s21, 1  ;;  %s914_s21 = sphi %s953_s21, %s16_s21  }
   0x2   : > { %p212_p1 = scmp.lt.s32.totalorder %s914_s21, 5 }
   0x4   : > { %p213_p2 = pnand %p695_p0, %p212_p1 }
   0x5   : > { %p1000_p3 = scmp.lt.s32.totalorder (!%p213_p2), %s691_s22, 3 }
   0x6   : > { %216 = sbr.rel (%p213_p2) target bundleno = 662 (0x296), region = 44 }
   0xb   : > { %v295_v0 = vld [vmem:[%s1244_s1 + $0xf8] sm:$0xff]  ;;  %v294_v2 = vld [vmem:[%s1244_s1 + $0xf0] sm:$0xff]  ;;  %v916_v4 = vmov 0.0   ;;  %v293_v5 = vld [vmem:[%s1244_s1 + $0xe8] sm:$0xff]  ;;  %vm917_vm0 = vmmov 0   ;;  %s1252_s22 = smov (!%p1000_p3, %s691_s22), 3 }
   0xc   : > { %v279_v1 = vld [vmem:[%s1244_s1 + $0x78] sm:$0xff]  ;;  %705 = vmatprep.subr.mxu0 %v295_v0  ;;  %v278_v3 = vld [vmem:[%s1244_s1 + $0x70] sm:$0xff]  ;;  %791 = vmatprep.subr.mxu1 %v916_v4  ;;  %v277_v7 = vld [vmem:[%s1244_s1 + $0x68] sm:$0xff]  ;;  %s704_s26 = sshll.u32 %s1252_s22, 4  ;;  %vm254_vm1 = vcmask 1046528   ;;  %vm259_vm2 = vcmask 1045504  }
   0xd   : > { %706 = vmatpush3.msra.mxu0 %v279_v1  ;;  %v311_v6 = vld [vmem:[%s1244_s1 + $0x178] sm:$0xff]  ;;  %823 = vmatprep.mubr.msk.f32.mxu1 %vm917_vm0, %v916_v4  ;;  %v310_v8 = vld [vmem:[%s1244_s1 + $0x170] sm:$0xff]  ;;  %v292_v9 = vld [vmem:[%s1244_s1 + $0xe0] sm:$0xff]  ;;  %s245_s15 = scalar_lea.vmem %s1243_s0, %s704_s26  ;;  %s698_s28 = sshll.u32 %s1252_s22, 3 }
   0xe   : > { %707 = vmatprep.subr.mxu0 %v294_v2  ;;  %792 = vmatpush3.msra.mxu1 %v311_v6  ;;  %v309_v10 = vld [vmem:[%s1244_s1 + $0x168] sm:$0xff]  ;;  %v276_v11 = vld [vmem:[%s1244_s1 + $0x60] sm:$0xff]  ;;  %v291_v12 = vld [vmem:[%s1244_s1 + $0xd8] sm:$0xff]  ;;  %s249_s9 = scalar_lea.vmem %s1249_s6, %s698_s28 }
   0xf   : > { %708 = vmatpush3.msra.mxu0 %v278_v3  ;;  %793 = vmatprep.subr.mxu1 %v916_v4  ;;  %v308_v13 = vld [vmem:[%s1244_s1 + $0x160] sm:$0xff]  ;;  %v275_v14 = vld [vmem:[%s1244_s1 + $0x58] sm:$0xff]  ;;  %v290_v15 = vld [vmem:[%s1244_s1 + $0xd0] sm:$0xff] }
  0x10   : > { %709 = vmatprep.subr.mxu0 %v293_v5  ;;  %794 = vmatpush3.msra.mxu1 %v310_v8  ;;  %v307_v16 = vld [vmem:[%s1244_s1 + $0x158] sm:$0xff]  ;;  %v274_v17 = vld [vmem:[%s1244_s1 + $0x50] sm:$0xff]  ;;  %v289_v18 = vld [vmem:[%s1244_s1 + $0xc8] sm:$0xff] }
  0x11   : > { %710 = vmatpush3.msra.mxu0 %v277_v7  ;;  %795 = vmatprep.subr.mxu1 %v916_v4  ;;  %v306_v19 = vld [vmem:[%s1244_s1 + $0x150] sm:$0xff]  ;;  %v273_v20 = vld [vmem:[%s1244_s1 + $0x48] sm:$0xff]  ;;  %v288_v21 = vld [vmem:[%s1244_s1 + $0xc0] sm:$0xff] }
  0x12   : > { %711 = vmatprep.subr.mxu0 %v292_v9  ;;  %796 = vmatpush3.msra.mxu1 %v309_v10  ;;  %v305_v22 = vld [vmem:[%s1244_s1 + $0x148] sm:$0xff]  ;;  %v272_v23 = vld [vmem:[%s1244_s1 + $0x40] sm:$0xff]  ;;  %v287_v24 = vld [vmem:[%s1244_s1 + $0xb8] sm:$0xff] }
  0x13   : > { %712 = vmatpush3.msra.mxu0 %v276_v11  ;;  %797 = vmatprep.subr.mxu1 %v916_v4  ;;  %v304_v25 = vld [vmem:[%s1244_s1 + $0x140] sm:$0xff]  ;;  %v271_v26 = vld [vmem:[%s1244_s1 + $0x38] sm:$0xff]  ;;  %v286_v27 = vld [vmem:[%s1244_s1 + $0xb0] sm:$0xff] }
  0x14   : > { %713 = vmatprep.subr.mxu0 %v291_v12  ;;  %798 = vmatpush3.msra.mxu1 %v308_v13  ;;  %v303_v28 = vld [vmem:[%s1244_s1 + $0x138] sm:$0xff]  ;;  %v270_v29 = vld [vmem:[%s1244_s1 + $0x30] sm:$0xff]  ;;  %v285_v30 = vld [vmem:[%s1244_s1 + $0xa8] sm:$0xff] }
  0x15   : > { %714 = vmatpush3.msra.mxu0 %v275_v14  ;;  %799 = vmatprep.subr.mxu1 %v916_v4  ;;  %v302_v31 = vld [vmem:[%s1244_s1 + $0x130] sm:$0xff]  ;;  %v269_v32 = vld [vmem:[%s1244_s1 + $0x28] sm:$0xff]  ;;  %v250_v33 = vld [vmem:[%s245_s15] sm:$0xff] }
  0x16   : > { %715 = vmatprep.subr.mxu0 %v290_v15  ;;  %800 = vmatpush3.msra.mxu1 %v307_v16  ;;  %v251_v34 = vld [vmem:[%s245_s15 + $0x8] sm:$0x3]  ;;  %v284_v35 = vld [vmem:[%s1244_s1 + $0xa0] sm:$0xff]  ;;  %v283_v38 = vld [vmem:[%s1244_s1 + $0x98] sm:$0xff]  ;;  %v255_v40 = vrot.slane %v250_v33, 1  ;;  %v260_v51 = vrot.slane %v250_v33, 2 }
  0x17   : > { %716 = vmatpush3.msra.mxu0 %v274_v17  ;;  %801 = vmatprep.subr.mxu1 %v916_v4  ;;  %v301_v36 = vld [vmem:[%s1244_s1 + $0x128] sm:$0xff]  ;;  %v268_v37 = vld [vmem:[%s1244_s1 + $0x20] sm:$0xff]  ;;  %v256_v41 = vrot.slane %v251_v34, 1  ;;  %v267_v42 = vld [vmem:[%s1244_s1 + $0x18] sm:$0xff]  ;;  %v261_v52 = vrot.slane %v251_v34, 2 }
  0x18   : > { %717 = vmatprep.subr.mxu0 %v289_v18  ;;  %802 = vmatpush3.msra.mxu1 %v306_v19  ;;  %v300_v39 = vld [vmem:[%s1244_s1 + $0x120] sm:$0xff]  ;;  %v282_v43 = vld [vmem:[%s1244_s1 + $0x90] sm:$0xff]  ;;  %v299_v44 = vld [vmem:[%s1244_s1 + $0x118] sm:$0xff] }
  0x19   : > { %718 = vmatpush3.msra.mxu0 %v273_v20  ;;  %803 = vmatprep.subr.mxu1 %v916_v4  ;;  %v266_v45 = vld [vmem:[%s1244_s1 + $0x10] sm:$0xff]  ;;  %v281_v46 = vld [vmem:[%s1244_s1 + $0x88] sm:$0xff]  ;;  %v257_v47 = vsel %vm254_vm1, %v255_v40, %v256_v41  ;;  %v280_v50 = vld [vmem:[%s1244_s1 + $0x80] sm:$0xff]  ;;  %v1138_v56 = vsel %vm259_vm2, %v260_v51, %v261_v52 }
  0x1a   : > { %719 = vmatprep.subr.mxu0 %v288_v21  ;;  %804 = vmatpush3.msra.mxu1 %v305_v22  ;;  %v265_v48 = vld [vmem:[%s1244_s1 + $0x8] sm:$0xff]  ;;  %v298_v49 = vld [vmem:[%s1244_s1 + $0x110] sm:$0xff]  ;;  %v264_v53 = vld [vmem:[%s1244_s1] sm:$0xff] }
  0x1b   : > { %720 = vmatpush3.msra.mxu0 %v272_v23  ;;  %805 = vmatprep.subr.mxu1 %v916_v4  ;;  %v297_v54 = vld [vmem:[%s1244_s1 + $0x108] sm:$0xff]  ;;  %v296_v55 = vld [vmem:[%s1244_s1 + $0x100] sm:$0xff]  ;;  %v476_v57 = vld [vmem:[%s1245_s2 + $0x78] sm:$0xff] }
  0x1c   : > { %721 = vmatprep.subr.mxu0 %v287_v24  ;;  %806 = vmatpush3.msra.mxu1 %v304_v25  ;;  %v475_v58 = vld [vmem:[%s1245_s2 + $0x70] sm:$0xff]  ;;  %v474_v59 = vld [vmem:[%s1245_s2 + $0x68] sm:$0xff]  ;;  %v473_v60 = vld [vmem:[%s1245_s2 + $0x60] sm:$0xff] }
  0x1d   : > { %722 = vmatpush3.msra.mxu0 %v271_v26  ;;  %807 = vmatprep.subr.mxu1 %v916_v4  ;;  %v472_v61 = vld [vmem:[%s1245_s2 + $0x58] sm:$0xff]  ;;  %v471_v62 = vld [vmem:[%s1245_s2 + $0x50] sm:$0xff]  ;;  %v470_v63 = vld [vmem:[%s1245_s2 + $0x48] sm:$0xff] }
  0x1e   : > { %723 = vmatprep.subr.mxu0 %v286_v27  ;;  %808 = vmatpush3.msra.mxu1 %v303_v28  ;;  %v469_v0 = vld [vmem:[%s1245_s2 + $0x40] sm:$0xff]  ;;  %v468_v1 = vld [vmem:[%s1245_s2 + $0x38] sm:$0xff]  ;;  %v467_v2 = vld [vmem:[%s1245_s2 + $0x30] sm:$0xff] }
  0x1f   : > { %724 = vmatpush3.msra.mxu0 %v270_v29  ;;  %809 = vmatprep.subr.mxu1 %v916_v4  ;;  %v466_v3 = vld [vmem:[%s1245_s2 + $0x28] sm:$0xff]  ;;  %v465_v5 = vld [vmem:[%s1245_s2 + $0x20] sm:$0xff]  ;;  %v464_v6 = vld [vmem:[%s1245_s2 + $0x18] sm:$0xff] }
  0x20   : > { %725 = vmatprep.subr.mxu0 %v285_v30  ;;  %810 = vmatpush3.msra.mxu1 %v302_v31  ;;  %v463_v7 = vld [vmem:[%s1245_s2 + $0x10] sm:$0xff]  ;;  %v462_v8 = vld [vmem:[%s1245_s2 + $0x8] sm:$0xff]  ;;  %v461_v9 = vld [vmem:[%s1245_s2] sm:$0xff] }
  0x21   : > { %726 = vmatpush3.msra.mxu0 %v269_v32  ;;  %811 = vmatprep.subr.mxu1 %v916_v4  ;;  %v699_v12 = vld [vmem:[%s1246_s3] ss:$0 sm:$0xff] }
  0x22   : > { %727 = vmatprep.subr.mxu0 %v284_v35  ;;  %812 = vmatpush3.msra.mxu1 %v301_v36  ;;  %v700_v27 = vld [vmem:[%s1247_s4] ss:$0 sm:$0xff] }
  0x23   : > { %728 = vmatpush3.msra.mxu0 %v268_v37  ;;  %813 = vmatprep.subr.mxu1 %v916_v4  ;;  %v701_v29 = vld [vmem:[%s1248_s5] ss:$0 sm:$0xff] }
  0x24   : > { %729 = vmatprep.subr.mxu0 %v283_v38  ;;  %814 = vmatpush3.msra.mxu1 %v300_v39 }
  0x25   : > { %730 = vmatpush3.msra.mxu0 %v267_v42  ;;  %815 = vmatprep.subr.mxu1 %v916_v4 }
  0x26   : > { %731 = vmatprep.subr.mxu0 %v282_v43  ;;  %816 = vmatpush3.msra.mxu1 %v299_v44 }
  0x27   : > { %732 = vmatpush3.msra.mxu0 %v266_v45  ;;  %817 = vmatprep.subr.mxu1 %v916_v4 }
  0x28   : > { %733 = vmatprep.subr.mxu0 %v281_v46  ;;  %383 = vmatprep.mubr.f32.mxu0 %v257_v47 }
  0x29   : > { %734 = vmatpush3.msra.mxu0 %v265_v48  ;;  %818 = vmatpush3.msra.mxu1 %v298_v49 }
  0x2a   : > { %735 = vmatprep.subr.mxu0 %v280_v50  ;;  %819 = vmatprep.subr.mxu1 %v916_v4 }
  0x2b   : > { %736 = vmatpush3.msra.mxu0 %v264_v53  ;;  %820 = vmatpush3.msra.mxu1 %v297_v54 }
  0x2c   : > { %384 = vmatmul.mubr.f32.vlgmr.msra.gmra.mxu0 %v250_v33  ;;  %821 = vmatprep.subr.mxu1 %v916_v4 }
  0x2d   : > { %822 = vmatpush3.msra.mxu1 %v296_v55  ;;  %826 = vmatprep.subr.mxu0 %v916_v4 }
  0x2e   : > { %824 = vmatmul.mubr.f32.vlgmr.msra.gmra.mxu1 %v1138_v56  ;;  %827 = vmatpush3.msra.mxu0 %v476_v57 }
  0x2f   : > { %828 = vmatprep.subr.mxu0 %v916_v4  ;;  %858 = vmatprep.mubr.msk.f32.mxu0 %vm917_vm0, %v916_v4 }
  0x30   : > { %829 = vmatpush3.msra.mxu0 %v475_v58  ;;  %861 = vmatprep.subr.mxu1 %v916_v4 }
  0x31   : > { %830 = vmatprep.subr.mxu0 %v916_v4  ;;  %862 = vmatpush3.msra.mxu1 %v476_v57 }
  0x32   : > { %831 = vmatpush3.msra.mxu0 %v474_v59  ;;  %863 = vmatprep.subr.mxu1 %v916_v4 }
  0x33   : > { %832 = vmatprep.subr.mxu0 %v916_v4  ;;  %864 = vmatpush3.msra.mxu1 %v475_v58 }
  0x34   : > { %833 = vmatpush3.msra.mxu0 %v473_v60  ;;  %865 = vmatprep.subr.mxu1 %v916_v4 }
  0x35   : > { %834 = vmatprep.subr.mxu0 %v916_v4  ;;  %866 = vmatpush3.msra.mxu1 %v474_v59 }
  0x36   : > { %835 = vmatpush3.msra.mxu0 %v472_v61  ;;  %867 = vmatprep.subr.mxu1 %v916_v4 }
  0x37   : > { %836 = vmatprep.subr.mxu0 %v916_v4  ;;  %868 = vmatpush3.msra.mxu1 %v473_v60 }
  0x38   : > { %837 = vmatpush3.msra.mxu0 %v471_v62  ;;  %869 = vmatprep.subr.mxu1 %v916_v4 }
  0x39   : > { %838 = vmatprep.subr.mxu0 %v916_v4  ;;  %870 = vmatpush3.msra.mxu1 %v472_v61 }
  0x3a   : > { %839 = vmatpush3.msra.mxu0 %v470_v63  ;;  %871 = vmatprep.subr.mxu1 %v916_v4 }
  0x3b   : > { %840 = vmatprep.subr.mxu0 %v916_v4  ;;  %872 = vmatpush3.msra.mxu1 %v471_v62 }
  0x3c   : > { %841 = vmatpush3.msra.mxu0 %v469_v0  ;;  %873 = vmatprep.subr.mxu1 %v916_v4 }
  0x3d   : > { %842 = vmatprep.subr.mxu0 %v916_v4  ;;  %874 = vmatpush3.msra.mxu1 %v470_v63 }
  0x3e   : > { %843 = vmatpush3.msra.mxu0 %v468_v1  ;;  %875 = vmatprep.subr.mxu1 %v916_v4 }
  0x3f   : > { %844 = vmatprep.subr.mxu0 %v916_v4  ;;  %876 = vmatpush3.msra.mxu1 %v469_v0 }
  0x40   : > { %877 = vmatprep.subr.mxu1 %v916_v4  ;;  %893 = vmatprep.mubr.msk.f32.mxu1 %vm917_vm0, %v916_v4 }
  0x41   : > { %878 = vmatpush3.msra.mxu1 %v468_v1  ;;  %845 = vmatpush3.msra.mxu0 %v467_v2 }
  0x42   : > { %879 = vmatprep.subr.mxu1 %v916_v4  ;;  %846 = vmatprep.subr.mxu0 %v916_v4 }
  0x43   : > { %880 = vmatpush3.msra.mxu1 %v467_v2  ;;  %847 = vmatpush3.msra.mxu0 %v466_v3 }
  0x44   : > { %881 = vmatprep.subr.mxu1 %v916_v4  ;;  %848 = vmatprep.subr.mxu0 %v916_v4 }
  0x45   : > { %882 = vmatpush3.msra.mxu1 %v466_v3  ;;  %849 = vmatpush3.msra.mxu0 %v465_v5 }
  0x46   : > { %883 = vmatprep.subr.mxu1 %v916_v4  ;;  %850 = vmatprep.subr.mxu0 %v916_v4 }
  0x47   : > { %884 = vmatpush3.msra.mxu1 %v465_v5  ;;  %851 = vmatpush3.msra.mxu0 %v464_v6 }
  0x48   : > { %885 = vmatprep.subr.mxu1 %v916_v4  ;;  %852 = vmatprep.subr.mxu0 %v916_v4 }
  0x49   : > { %886 = vmatpush3.msra.mxu1 %v464_v6  ;;  %853 = vmatpush3.msra.mxu0 %v463_v7 }
  0x4a   : > { %887 = vmatprep.subr.mxu1 %v916_v4  ;;  %854 = vmatprep.subr.mxu0 %v916_v4 }
  0x4b   : > { %888 = vmatpush3.msra.mxu1 %v463_v7  ;;  %855 = vmatpush3.msra.mxu0 %v462_v8 }
  0x4c   : > { %889 = vmatprep.subr.mxu1 %v916_v4  ;;  %856 = vmatprep.subr.mxu0 %v916_v4 }
  0x4d   : > { %890 = vmatpush3.msra.mxu1 %v462_v8  ;;  %857 = vmatpush3.msra.mxu0 %v461_v9 }
  0x4e   : > { %891 = vmatprep.subr.mxu1 %v916_v4 }
  0x4f   : > { %892 = vmatpush3.msra.mxu1 %v461_v9 }
  0xec   : > { %v737_v10 = vpop.f32.mrf.mxu0 }
  0xee   : > { %v738_v11 = vpop.f32.mrf.mxu0  ;;  %v455_v13 = vpop.f32.mrf.mxu1 }
  0xef   : > { %v739_v14 = vadd.f32 %v738_v11, %v737_v10 }
  0xf0   : > { %v825_v15 = vpop.f32.mrf.mxu1 }
  0xf1   : > { %v386_v16 = vadd.f32 %v739_v14, %v699_v12 }
  0xf3   : > { %v456_v17 = vadd.f32 %v455_v13, %v386_v16 }
  0xf5   : > { %v459_v18 = vmax.f32 %v456_v17, 0.0 }
  0xf7   : > { %v460_v19 = vadd.f32 %v459_v18, %v1138_v56 }
  0xf9   : > { %859 = vmatmul.mubr.f32.vlgmr.msra.gmra.mxu0 %v460_v19 }
 0x1b9   : > { %v543_v20 = vpop.f32.mrf.mxu0 }
 0x1ba   : > { %v547_v4 = vsub.f32 %v460_v19, %v543_v20 }
 0x1bb   : > { %v860_v21 = vpop.f32.mrf.mxu0 }
 0x1bc   : > { %v548_v22 = vmul.f32 %v547_v4, %v547_v4 }
 0x1be   : > { %894 = vmatmul.mubr.f32.vlgmr.msra.gmra.mxu1 %v548_v22 }
 0x27e   : > { %v615_v23 = vpop.f32.mrf.mxu1 }
 0x27f   : > { %v616_v24 = vadd.f32 1e-05, %v615_v23 }
 0x280   : > { %v895_v25 = vpop.f32.mrf.mxu1 }
 0x281   : > { %906 = vrsqrt.f32 %v616_v24 }
 0x28e   : > { %v907_v26 = vpop.eup %906 }
 0x28f   : > { %v620_v28 = vmul.f32 %v907_v26, %v547_v4 }
 0x291   : > { %v628_v30 = vmul.f32 %v700_v27, %v620_v28 }
 0x293   : > { %v636_v31 = vadd.f32 %v701_v29, %v628_v30 }
 0x295   : > { %637 = vst [vmem:[%s249_s9] sm:$0xff] %v636_v31 }
 0x296 PF: > { %s16_s21 = sadd.s32 1, %s914_s21  }
 0x297   : > { %p13_p4 = scmp.ge.s32.totalorder %s16_s21, 6  }
 0x299   :  { %15 = sbr.rel (!%p13_p4) target bundleno = 1 (0x1), region = 74 }

</bundles_post_ra>
